<compile_context>
chip_gen: v7x
topology: tpu7x:2x2x1
jax: 0.10.0
libtpu: 0.0.40
codegen_flags: <defaults>
</compile_context>

<pallas_src>
import functools

import jax
import jax.numpy as jnp
from jax.experimental import pallas as pl
from jax.experimental.pallas import tpu as pltpu


def _round_up(x: int, m: int) -> int:
    return ((x + m - 1) // m) * m


def _mf_kernel(u_ref, it_ref, ub_ref, ib_ref, o_ref):
    # u_ref:  (tb, D)  user embeddings for this user block (emb dtype)
    # it_ref: (D, ti)  item embeddings, pre-transposed (lane-dense over items)
    # ub_ref: (tb, 1)  f32 user bias
    # ib_ref: (1, ti)  f32 item bias (pre-transposed)
    # o_ref:  (tb, ti) scores
    scores = jnp.dot(u_ref[...], it_ref[...], preferred_element_type=jnp.float32)
    o_ref[...] = (scores + ub_ref[...] + ib_ref[...]).astype(o_ref.dtype)


def _pick_tiles(B: int, I: int, tb_max: int, ti_max: int):
    """Choose (user, item) tile sizes for the (B, I) output.

    - Whole batch in one block when B <= tb_max (no row padding at all);
      larger batches use tb_max-row blocks with a ragged final block whose
      invalid rows are never written back to HBM.
    - Item tile is a multiple of 128 lanes (and <= I) so stores are unmasked
      lane-dense except at the ragged tail; no pad+slice pass over the output.
    - If the whole grid would collapse to one step, split the item axis so
      v7x's two TensorCores both get a block (cheap no-op on v5e/v6e).
    """
    tb = B if B <= tb_max else tb_max
    nb = pl.cdiv(B, tb)
    if I <= 128:
        ti = I  # lane dim < 128 must be the full extent
    else:
        ti = min(ti_max, (I // 128) * 128)
        if nb == 1 and pl.cdiv(I, ti) == 1 and I >= 256:
            ti = _round_up(pl.cdiv(I, 2), 128)  # still <= I for I >= 256
    return tb, ti


@functools.partial(jax.jit, static_argnames=("out_dtype", "tb_max", "ti_max"))
def _mf_forward(users, user_emb, user_bias, item_emb_t, item_bias_t, *,
                out_dtype=jnp.float32, tb_max=256, ti_max=2048):
    """users: (B,) int indices.  item_emb_t: (D, I), item_bias_t: (1, I).

    Returns (B, I) scores in out_dtype.
    """
    B = users.shape[0]
    D, I = item_emb_t.shape

    # Per-call glue: just the small, irregular user-row gathers.
    u_emb = user_emb[users]      # (B, D)  emb dtype
    u_bias = user_bias[users]    # (B, 1)  f32

    tb, ti = _pick_tiles(B, I, tb_max, ti_max)
    # Item blocks outer, user blocks inner: the item tile index does not change
    # over the inner loop, so the item table streams from HBM exactly once.
    grid = (pl.cdiv(I, ti), pl.cdiv(B, tb))

    return pl.pallas_call(
        _mf_kernel,
        out_shape=jax.ShapeDtypeStruct((B, I), out_dtype),
        grid_spec=pltpu.PrefetchScalarGridSpec(
            num_scalar_prefetch=0,
            grid=grid,
            in_specs=[
                pl.BlockSpec((tb, D), lambda j, i: (i, 0)),   # user embeddings
                pl.BlockSpec((D, ti), lambda j, i: (0, j)),   # item embeddings (D, I)
                pl.BlockSpec((tb, 1), lambda j, i: (i, 0)),   # user bias (f32)
                pl.BlockSpec((1, ti), lambda j, i: (0, j)),   # item bias (f32, transposed)
            ],
            out_specs=pl.BlockSpec((tb, ti), lambda j, i: (i, j)),
        ),
        compiler_params=pltpu.CompilerParams(
            dimension_semantics=("parallel", "parallel"),
        ),
    )(u_emb, item_emb_t, u_bias, item_bias_t)


class MatrixFactorizationTPU:
    """Inference-only port of MatrixFactorizaiton.forward.

    Weight packing (dtype cast + item-table transpose) happens ONCE here and is
    cached as module state, so the per-call jitted forward does no full-table
    HBM copies.
    """

    def __init__(self, user_emb_table, user_bias_table,
                 item_emb_table, item_bias_table, *,
                 emb_dtype=jnp.bfloat16,     # float32 available for bit parity
                 out_dtype=jnp.float32,      # bfloat16 opt-in halves writeback
                 tb_max=256, ti_max=2048):
        self.user_emb = jnp.asarray(user_emb_table).astype(emb_dtype)        # (U, D)
        self.user_bias = jnp.asarray(user_bias_table).astype(jnp.float32)    # (U, 1)
        self.item_emb_t = jnp.asarray(item_emb_table).astype(emb_dtype).T    # (D, I)
        self.item_bias_t = jnp.asarray(item_bias_table).astype(jnp.float32).T  # (1, I)
        self.out_dtype = out_dtype
        self.tb_max = tb_max
        self.ti_max = ti_max

    def __call__(self, users):
        return _mf_forward(users, self.user_emb, self.user_bias,
                           self.item_emb_t, self.item_bias_t,
                           out_dtype=self.out_dtype,
                           tb_max=self.tb_max, ti_max=self.ti_max)


if __name__ == "__main__":
    # Small deterministic setup consistent with the module's __init__.
    # Non-multiple sizes on purpose to exercise ragged blocks (300 = 256 + 44).
    user_size, item_size, emb_dim = 64, 300, 32
    batch = 12

    key = jax.random.PRNGKey(0)
    k1, k2, k3, k4, k5 = jax.random.split(key, 5)

    user_emb_table = jax.random.normal(k1, (user_size, emb_dim), jnp.float32)
    user_bias_table = jax.random.normal(k2, (user_size, 1), jnp.float32)
    item_emb_table = jax.random.normal(k3, (item_size, emb_dim), jnp.float32)
    item_bias_table = jax.random.normal(k4, (item_size, 1), jnp.float32)

    users = jax.random.randint(k5, (batch,), 0, user_size, jnp.int32)

    model = MatrixFactorizationTPU(user_emb_table, user_bias_table,
                                   item_emb_table, item_bias_table)

    # Reference (pure JAX, same semantics; embeddings go through the same
    # one-time bf16 cast the kernel streams, biases stay f32).
    def ref_scores(u):
        u_e = user_emb_table.astype(jnp.bfloat16)[u].astype(jnp.float32)
        i_e = item_emb_table.astype(jnp.bfloat16).astype(jnp.float32)
        return u_e @ i_e.T + user_bias_table[u] + item_bias_table.T

    out = jax.block_until_ready(model(users))
    assert out.shape == (batch, item_size)
    ref = ref_scores(users)
    assert jnp.allclose(out, ref, atol=1e-3, rtol=1e-3), (
        float(jnp.max(jnp.abs(out - ref))))

    # Second, differently-shaped batch to exercise another ragged user block.
    users2 = jax.random.randint(jax.random.PRNGKey(1), (5,), 0, user_size, jnp.int32)
    out2 = jax.block_until_ready(model(users2))
    ref2 = ref_scores(users2)
    assert out2.shape == (5, item_size)
    assert jnp.allclose(out2, ref2, atol=1e-3, rtol=1e-3), (
        float(jnp.max(jnp.abs(out2 - ref2))))

    print("KERNEL_OK")
</pallas_src>

<mosaic_0001>
module attributes {stable_mosaic.version = 11 : i64} {
  func.func @_mf_kernel(%arg0: i32, %arg1: i32, %arg2: memref<12x32xbf16, #tpu.memory_space<vmem>>, %arg3: memref<32x256xbf16, #tpu.memory_space<vmem>>, %arg4: memref<12x1xf32, #tpu.memory_space<vmem>>, %arg5: memref<1x256xf32, #tpu.memory_space<vmem>>, %arg6: memref<12x256xf32, #tpu.memory_space<vmem>>) attributes {dimension_semantics = [#tpu.dimension_semantics<parallel>, #tpu.dimension_semantics<parallel>], iteration_bounds = array<i64: 2, 1>, scalar_prefetch = 0 : i64, scratch_operands = 0 : i64, tpu.core_type = #tpu.core_type<tc>, window_params = [{transform_indices = @transform_0, window_bounds = array<i64: 12, 32>}, {transform_indices = @transform_1, window_bounds = array<i64: 32, 256>}, {transform_indices = @transform_2, window_bounds = array<i64: 12, 1>}, {transform_indices = @transform_3, window_bounds = array<i64: 1, 256>}, {transform_indices = @transform_4, window_bounds = array<i64: 12, 256>}]} {
    %c0 = arith.constant 0 : index
    %c0_0 = arith.constant 0 : index
    %0 = vector.load %arg2[%c0, %c0_0] : memref<12x32xbf16, #tpu.memory_space<vmem>>, vector<12x32xbf16>
    %c0_1 = arith.constant 0 : index
    %c0_2 = arith.constant 0 : index
    %1 = vector.load %arg3[%c0_1, %c0_2] : memref<32x256xbf16, #tpu.memory_space<vmem>>, vector<32x256xbf16>
    %cst = arith.constant dense<0.000000e+00> : vector<12x256xf32>
    %2 = tpu.matmul %0, %1, %cst {dimension_numbers = #tpu.dot_dimension_numbers<[1], [0], [0], [1], [0, 0, 1, 1], [], []>} : vector<12x32xbf16>, vector<32x256xbf16>, vector<12x256xf32> -> vector<12x256xf32>
    %c0_3 = arith.constant 0 : index
    %c0_4 = arith.constant 0 : index
    %3 = vector.load %arg4[%c0_3, %c0_4] : memref<12x1xf32, #tpu.memory_space<vmem>>, vector<12x1xf32>
    %4 = vector.broadcast %3 : vector<12x1xf32> to vector<12x256xf32>
    %5 = arith.addf %2, %4 : vector<12x256xf32>
    %c0_5 = arith.constant 0 : index
    %c0_6 = arith.constant 0 : index
    %6 = vector.load %arg5[%c0_5, %c0_6] : memref<1x256xf32, #tpu.memory_space<vmem>>, vector<1x256xf32>
    %7 = vector.broadcast %6 : vector<1x256xf32> to vector<12x256xf32>
    %8 = arith.addf %5, %7 : vector<12x256xf32>
    %c0_7 = arith.constant 0 : index
    %c0_8 = arith.constant 0 : index
    %9 = vector.load %arg6[%c0_7, %c0_8] : memref<12x256xf32, #tpu.memory_space<vmem>>, vector<12x256xf32>
    tpu.vector_store %arg6[%c0_7, %c0_8], %8 {strides = array<i32>} : memref<12x256xf32, #tpu.memory_space<vmem>>, vector<12x256xf32>,
    return
  }
  func.func @transform_0(%arg0: i32, %arg1: i32) -> (i32, i32) {
    %c0_i32 = arith.constant 0 : i32
    %c0_i32_0 = arith.constant 0 : i32
    return %arg1, %c0_i32 : i32, i32
  }
  func.func @transform_1(%arg0: i32, %arg1: i32) -> (i32, i32) {
    %c0_i32 = arith.constant 0 : i32
    %c0_i32_0 = arith.constant 0 : i32
    return %c0_i32, %arg0 : i32, i32
  }
  func.func @transform_2(%arg0: i32, %arg1: i32) -> (i32, i32) {
    %c0_i32 = arith.constant 0 : i32
    %c0_i32_0 = arith.constant 0 : i32
    return %arg1, %c0_i32 : i32, i32
  }
  func.func @transform_3(%arg0: i32, %arg1: i32) -> (i32, i32) {
    %c0_i32 = arith.constant 0 : i32
    %c0_i32_0 = arith.constant 0 : i32
    return %c0_i32, %arg0 : i32, i32
  }
  func.func @transform_4(%arg0: i32, %arg1: i32) -> (i32, i32) {
    %c0_i32 = arith.constant 0 : i32
    return %arg1, %arg0 : i32, i32
  }
}

</mosaic_0001>

<bundles_post_ra>
// kernel: _mf_forward.1
= control target key start
LH: loop header
LB: loop body
LE: loop exit
PB: predicated region body
PF: predicated region fallthrough
CT: control target
= control target key end

     0   :  { %s1801_s0 = inlined_call_operand.vmem [shape: bf16[12,32], index: 0, kind: input, shape index: {}]   ;;  %s1802_s1 = inlined_call_operand.vmem [shape: bf16[32,300], index: 1, kind: input, shape index: {}]   ;;  %s1803_s2 = inlined_call_operand.vmem [shape: f32[12,1], index: 2, kind: input, shape index: {}]   ;;  %s1804_s3 = inlined_call_operand.vmem [shape: f32[1,300], index: 3, kind: input, shape index: {}]   ;;  %s1805_s4 = inlined_call_operand.hbm [shape: f32[12,300], index: 4, kind: output, shape index: {}]  }
   0x1   :  { %1806 = sst [smem:[#allocation6_spill]] %s1802_s1 }
   0x2   :  { %9 = vsyncpa [#allocation4], 0 }
   0x3   :  { %11 = vsyncpa [#allocation4 + $0x1], 0  ;;  %s1535_s15 = smov 0   ;;  %s1537_s16 = smov 0  }
   0x4   :  { %s1539_s17 = smov 0   ;;  %s1541_s18 = smov 0  }
   0x5   :  { %s1543_s19 = smov 0   ;;  %s1545_s20 = smov 0  }
   0x6 LB: > { %s1072_s21 = sadd.s32 4294967295, %s1470_s20   ;;  %s1073_s22 = sadd.s32 4294967294, %s1470_s20   ;;  %s1470_s20 = sphi %s1545_s20, %s17_s20   ;;  %s1466_s19 = sphi %s1543_s19, %s1820_s19   ;;  %s1462_s18 = sphi %s1541_s18, %s1819_s18   ;;  %s1458_s17 = sphi %s1539_s17, %s1818_s17   ;;  %s1454_s16 = sphi %s1537_s16, %s1817_s16   ;;  %s1450_s15 = sphi %s1535_s15, %s1816_s15  }
   0x7   : > { %s29_s23 = sadd.s32 1, %s1466_s19  ;;  %s62_s24 = sadd.s32 1, %s1458_s17 }
   0x8   : > { %p31_p0 = scmp.ge.s32.totalorder %s29_s23, 2  ;;  %p69_p1 = scmp.ne.s32.totalorder %s1458_s17, %s1454_s16 }
   0x9   : > { %p70_p2 = scmp.eq.s32.totalorder %s1470_s20, 0  ;;  %p153_p3 = scmp.eq.s32.totalorder %s1072_s21, 1 }
   0xa   : > { %s1822_s23 = smov (%p31_p0, %s29_s23), 0  ;;  %p158_p6 = scmp.ne.s32.totalorder %s1454_s16, %s1450_s15 }
   0xb   : > { %p71_p4 = por %p70_p2, %p69_p1  ;;  %p1574_p5 = por %p153_p3, %p69_p1 }
   0xc   : > { %s59_s26 = ssub.s32 %s1466_s19, %s1822_s23  ;;  %p159_p8 = scmp.eq.s32.totalorder %s1073_s22, 1 }
   0xd   : > { %p60_p7 = scmp.eq.s32.totalorder %s59_s26, 0  ;;  %p1077_p10 = scmp.ge.s32.totalorder %s1470_s20, 2 }
   0xe   : > { %p1585_p9 = por %p159_p8, %p158_p6 }
   0xf   : > { %s1583_s27 = scalar_select %p60_p7, %s1458_s17, %s62_s24  }
  0x10   : > { %193 = sbr.rel (%p1077_p10) target bundleno = 111 (0x6f), region = 24 }
  0x17   : > { %196 = sbr.rel (!%p71_p4) target bundleno = 111 (0x6f), region = 28  ;;  %s198_s29 = sand.u32 (%p71_p4), 1, %s1458_s17  }
  0x18   : > { %s1079_s30 = sshll.u32 (%p71_p4), %s1466_s19, 1  ;;  %s1078_s5 = sshll.u32 (%p71_p4), %s198_s29, 5 }
  0x19   : > { %s202_s6 = ssub.s32 (%p71_p4), 3, %s1079_s30  ;;  %s1125_s7 = sshll.u32 (%p71_p4), %s1466_s19, 3 }
  0x1a   : > { %p203_p11 = scmp.lt.s32.totalorder (%p71_p4), %s202_s6, 2  ;;  %s1809_s1 = sld [smem:[#allocation6_spill]] (%p71_p4) }
  0x1b   : > { %s1602_s13 = scalar_lea.vmem (%p71_p4), [#allocation2], %s1078_s5  }
  0x1e   : > { %s1824_s6 = smov (!%p203_p11, %s202_s6), 2 }
  0x1f   : > { %s1080_s11 = sshll.u32 %s1824_s6, 8  ;;  %s1600_s12 = sshll.u32 %s1824_s6, 2 }
  0x20   : > { %s1598_s10 = scalar_lea.vmem %s1809_s1, %s1125_s7   ;;  %p1084_p12 = scmp.eq.s32.totalorder %s1080_s11, 0 }
  0x21   : > { %p213_p13 = scmp.lt.u32.totalorder (!%p1084_p12), %s1600_s12, 8 }
  0x22   : > { %212 = sbr.rel (%p1084_p12) target bundleno = 111 (0x6f), region = 32 }
  0x29   : > { %216 = sbr.rel (%p213_p13) target bundleno = 102 (0x66), region = 36  ;;  %s1606_s14 = sand.u32 (!%p213_p13), 7, %s1600_s12  }
  0x2a   : > { %p238_p0 = scmp.eq.s32.totalorder (!%p213_p13), %s1606_s14, 0  ;;  %p1085_p1 = scmp.ne.s32.totalorder (!%p213_p13), %s1606_s14, 0 }
  0x30   : > { %241 = sbr.rel (%p1085_p1) target bundleno = 72 (0x48), region = 51  ;;  %s242_s21 = sshrl.u32 (!%p1085_p1), %s1600_s12, 3 }
  0x31   : > { %s243_s22 = sshrl.u32 (!%p1085_p1), %s242_s21, 4  ;;  %s1611_s24 = sand.u32 (!%p1085_p1), 15, %s242_s21  }
  0x32   : > { %s1126_s26 = sshll.u32 (!%p1085_p1), %s243_s22, 11  ;;  %p1092_p2 = scmp.le.s32.totalorder (!%p1085_p1), %s1611_s24, 0 }
  0x33   : > { %s394_s29 = sshra.s32 (!%p1085_p1), %s1126_s26, 4 }
  0x34   : > { %s1614_s30 = scalar_lea.vmem (!%p1085_p1), %s1598_s10, %s394_s29   ;;  %s1617_s5 = scalar_lea.vmem (!%p1085_p1), %s1602_s13, %s394_s29 [#allocation2]  }
  0x37   : > { %982 = sbr.rel (%p1092_p2) target bundleno = 72 (0x48), region = 174  ;;  %s1810_s6 = smov (!%p1092_p2), %s1617_s5 }
  0x38   : > { %s1811_s7 = smov (!%p1092_p2), %s1614_s30  ;;  %s1626_s8 = smov (!%p1092_p2), 0  }
  0x39   : > { %s1484_s9 = smov (!%p1092_p2), 0  }
  0x3e LB: >> { %v410_v0 = vld [vmem:[%s1478_s7] sm:$0xff]  ;;  %v412_v1 = vld [vmem:[%s1478_s7 + $0xc] sm:$0xff]  ;;  %v414_v2 = vld [vmem:[%s1478_s7 + $0x18] sm:$0xff]  ;;  %s418_s11 = sadd.s32 1, %s1482_s8  ;;  %s404_s9 = sadd.s32 1, %s1486_s9   ;;  %s1486_s9 = sphi %s1484_s9, %s404_s9   ;;  %s1482_s8 = sphi %s1626_s8, %s1812_s8   ;;  %s1478_s7 = sphi %s1811_s7, %s423_s7   ;;  %s1474_s6 = sphi %s1810_s6, %s424_s6  }
  0x3f   : >> { %411 = vst [vmem:[%s1474_s6] sm:$0xff] %v410_v0  ;;  %413 = vst [vmem:[%s1474_s6 + $0x8] sm:$0xff] %v412_v1  ;;  %v416_v3 = vld [vmem:[%s1478_s7 + $0x24] sm:$0xff]  ;;  %p419_p3 = scmp.ge.s32.totalorder %s418_s11, %s1611_s24  ;;  %p403_p4 = scmp.ge.s32.totalorder %s404_s9, %s1611_s24 }
  0x40   : >> { %415 = vst [vmem:[%s1474_s6 + $0x10] sm:$0xff] %v414_v2  ;;  %417 = vst [vmem:[%s1474_s6 + $0x18] sm:$0xff] %v416_v3 }
  0x41   : >> { %s1826_s11 = smov (%p419_p3, %s418_s11), 0  ;;  %406 = sbr.rel (!%p403_p4) target bundleno = 62 (0x3e), region = 180 }
  0x42   : >> { %s1093_s21 = sshll.u32 %s1826_s11, 3  ;;  %s1812_s8 = smov %s1826_s11 }
  0x43   : >> { %s423_s7 = scalar_lea.vmem %s1614_s30, %s1093_s21   ;;  %s424_s6 = scalar_lea.vmem %s1617_s5, %s1093_s21 [#allocation2]  }
  0x48 PF: > { %427 = sbr.rel (%p238_p0) target bundleno = 102 (0x66), region = 69  ;;  %s429_s22 = ssub.s32 (!%p238_p0), %s1600_s12, %s1606_s14 }
  0x49   : > { %s433_s26 = sshrl.u32 (!%p238_p0), %s1600_s12, 3  ;;  %s1647_s29 = scalar_lea.vmem (!%p238_p0), %s1598_s10, %s429_s22 }
  0x4a   : > { %s1650_s8 = scalar_lea.vmem (!%p238_p0), %s1602_s13, %s429_s22 [#allocation2]  ;;  %s434_s9 = sshrl.u32 (!%p238_p0), %s433_s26, 4 }
  0x4b   : > { %s1652_s11 = sand.u32 (!%p238_p0), 15, %s433_s26   ;;  %s1128_s24 = sshll.u32 (!%p238_p0), %s434_s9, 11 }
  0x4c   : > { %s585_s30 = sshra.s32 (!%p238_p0), %s1128_s24, 4  ;;  %p1101_p6 = scmp.le.s32.totalorder (!%p238_p0), %s1652_s11, 0 }
  0x4d   : > { %s1655_s5 = scalar_lea.vmem (!%p238_p0), %s1598_s10, %s585_s30   ;;  %s1658_s6 = scalar_lea.vmem (!%p238_p0), %s1602_s13, %s585_s30 [#allocation2]  }
  0x4f   : > { %1010 = sbr.rel (%p1101_p6) target bundleno = 96 (0x60), region = 196  ;;  %s1813_s7 = smov (!%p1101_p6), %s1658_s6 }
  0x50   : > { %s1814_s21 = smov (!%p1101_p6), %s1655_s5  ;;  %s1667_s22 = smov (!%p1101_p6), 0  }
  0x51   : > { %s1500_s1 = smov (!%p1101_p6), 0  }
  0x56 LB: >> { %v601_v4 = vld [vmem:[%s1494_s21] sm:$0xff]  ;;  %v603_v5 = vld [vmem:[%s1494_s21 + $0xc] sm:$0xff]  ;;  %v605_v6 = vld [vmem:[%s1494_s21 + $0x18] sm:$0xff]  ;;  %s609_s26 = sadd.s32 1, %s1498_s22  ;;  %s595_s1 = sadd.s32 1, %s1502_s1   ;;  %s1502_s1 = sphi %s1500_s1, %s595_s1   ;;  %s1498_s22 = sphi %s1667_s22, %s1815_s22   ;;  %s1494_s21 = sphi %s1814_s21, %s614_s21   ;;  %s1490_s7 = sphi %s1813_s7, %s615_s7  }
  0x57   : >> { %602 = vst [vmem:[%s1490_s7] sm:$0xff] %v601_v4  ;;  %604 = vst [vmem:[%s1490_s7 + $0x8] sm:$0xff] %v603_v5  ;;  %v607_v7 = vld [vmem:[%s1494_s21 + $0x24] sm:$0xff]  ;;  %p610_p7 = scmp.ge.s32.totalorder %s609_s26, %s1652_s11  ;;  %p594_p8 = scmp.ge.s32.totalorder %s595_s1, %s1652_s11 }
  0x58   : >> { %606 = vst [vmem:[%s1490_s7 + $0x10] sm:$0xff] %v605_v6  ;;  %608 = vst [vmem:[%s1490_s7 + $0x18] sm:$0xff] %v607_v7 }
  0x59   : >> { %s1828_s26 = smov (%p610_p7, %s609_s26), 0  ;;  %597 = sbr.rel (!%p594_p8) target bundleno = 86 (0x56), region = 202 }
  0x5a   : >> { %s1102_s9 = sshll.u32 %s1828_s26, 3  ;;  %s1815_s22 = smov %s1828_s26 }
  0x5b   : >> { %s614_s21 = scalar_lea.vmem %s1655_s5, %s1102_s9   ;;  %s615_s7 = scalar_lea.vmem %s1658_s6, %s1102_s9 [#allocation2]  }
  0x60 PF: > { %s1504_s24 = smov 0  }
  0x61   : > { %s616_s30 = sshllo.u32 %s1504_s24, %s1606_s14 }
  0x62   : > { %v625_v8 = vld [vmem:[%s1647_s29] sm:%s616_s30]  ;;  %v627_v9 = vld [vmem:[%s1647_s29 + $0xc] sm:%s616_s30] }
  0x63   : > { %626 = vst [vmem:[%s1650_s8] sm:%s616_s30] %v625_v8  ;;  %628 = vst [vmem:[%s1650_s8 + $0x8] sm:%s616_s30] %v627_v9 }
  0x64   : > { %v629_v10 = vld [vmem:[%s1647_s29 + $0x18] sm:%s616_s30]  ;;  %v631_v11 = vld [vmem:[%s1647_s29 + $0x24] sm:%s616_s30] }
  0x65   : > { %630 = vst [vmem:[%s1650_s8 + $0x10] sm:%s616_s30] %v629_v10  ;;  %632 = vst [vmem:[%s1650_s8 + $0x18] sm:%s616_s30] %v631_v11 }
  0x66 PF: > { %p1104_p11 = scmp.ge.u32.totalorder %s1600_s12, 8 }
  0x67   : > { %s1505_s1 = smov (!%p1104_p11), 0  }
  0x68   : > { %219 = sbr.rel (%p1104_p11) target bundleno = 111 (0x6f), region = 40  ;;  %s220_s14 = sshllo.u32 (!%p1104_p11), %s1505_s1, %s1600_s12 }
  0x69   : > { %v229_v12 = vld [vmem:[%s1598_s10] sm:%s220_s14] (!%p1104_p11)  ;;  %v231_v13 = vld [vmem:[%s1598_s10 + $0xc] sm:%s220_s14] (!%p1104_p11) }
  0x6a   : > { %230 = vst [vmem:[%s1602_s13] sm:%s220_s14] (!%p1104_p11), %v229_v12  ;;  %232 = vst [vmem:[%s1602_s13 + $0x8] sm:%s220_s14] (!%p1104_p11), %v231_v13 }
  0x6b   : > { %v233_v14 = vld [vmem:[%s1598_s10 + $0x18] sm:%s220_s14] (!%p1104_p11)  ;;  %v235_v15 = vld [vmem:[%s1598_s10 + $0x24] sm:%s220_s14] (!%p1104_p11) }
  0x6c   : > { %234 = vst [vmem:[%s1602_s13 + $0x10] sm:%s220_s14] (!%p1104_p11), %v233_v14  ;;  %236 = vst [vmem:[%s1602_s13 + $0x18] sm:%s220_s14] (!%p1104_p11), %v235_v15 }
  0x6f PF: > { %p1105_p12 = scmp.ge.s32.totalorder %s1470_s20, 1  ;;  %p651_p13 = scmp.lt.s32.totalorder %s1470_s20, 3 }
  0x71   : > { %p652_p0 = pnand %p1105_p12, %p651_p13 }
  0x72   : > { %s658_s12 = sand.u32 (!%p652_p0), 1, %s1454_s16   ;;  %v1506_v16 = vmov (!%p652_p0), 0   ;;  %v744_v17 = vld [vmem:[%s1803_s2] sm:$0xff] (!%p652_p0)  ;;  %v745_v18 = vld [vmem:[%s1803_s2 + $0x8] sm:$0xf] (!%p652_p0)  ;;  %vm781_vm0 = vcmask (!%p652_p0), 261120   ;;  %v830_v24 = vlaneseq (!%p652_p0) }
  0x73   : > { %655 = sbr.rel (%p652_p0) target bundleno = 375 (0x177), region = 98  ;;  %s1706_s29 = sshll.u32 (!%p652_p0), %s658_s12, 5  ;;  %817 = vmatprep.mubr.bf16.mxu0 (!%p652_p0), %v1506_v16  ;;  %1320 = vset.pattern.permute.xlu0 (!%p652_p0), %v1506_v16  ;;  %v1327_v23 = vld [vmem:[%s1801_s0] sm:$0x3f] (!%p652_p0)  }
  0x74   : > { %748 = vperm.xlu0 (!%p652_p0), %1320, %v744_v17   ;;  %s660_s5 = scalar_lea.vmem (!%p652_p0), [#allocation2], %s1706_s29  ;;  %s1719_s21 = sshll.u32 (!%p652_p0), %s1462_s18, 1  ;;  %v831_v25 = vshrl.u32 (!%p652_p0), %v830_v24, 7 }
  0x75   : > { %v1321_v19 = vld [vmem:[%s660_s5 + $0x4] ss:$8 sps:$4 sm:$0xff] (!%p652_p0)   ;;  %v1323_v20 = vld [vmem:[%s660_s5] ss:$8 sps:$4 sm:$0xff] (!%p652_p0)   ;;  %v1324_v21 = vld [vmem:[%s660_s5 + $0x14] ss:$8 sps:$4 sm:$0xff] (!%p652_p0)  }
  0x76   : > { %785 = vmatprep.subr.bf16.mxu0 (!%p652_p0), %v1321_v19  ;;  %v1326_v22 = vld [vmem:[%s660_s5 + $0x10] ss:$8 sps:$4 sm:$0xff] (!%p652_p0)   ;;  %p723_p1 = scmp.lt.s32.totalorder (!%p652_p0), %s1719_s21, 2  ;;  %v832_v26 = vsub.s32 (!%p652_p0), 0, %v831_v25  ;;  %v836_v29 = vsub.s32 (!%p652_p0), 1, %v831_v25  ;;  %s700_s30 = scalar_lea.vmem (!%p652_p0), [#allocation3], %s1706_s29 }
  0x77   : > { %786 = vmatpush1.bf16.msra.mxu0 (!%p652_p0), %v1323_v20  ;;  %s1729_s1 = scalar_lea.sflag (!%p652_p0), [#allocation4], %s658_s12 }
  0x78   : > { %753 = vperm.xlu0 (!%p652_p0), %1320, %v745_v18   ;;  %787 = vmatprep.subr.bf16.mxu0 (!%p652_p0), %v1324_v21 }
  0x7a   : > { %s724_s22 = scalar_select %p723_p1, %s1719_s21, 2 }
  0x7b   : > { %788 = vmatpush1.bf16.msra.mxu0 %v1326_v22  ;;  %s858_s14 = ssub.s32 (%p1574_p5), 3, %s1719_s21 }
  0x7c   : > { %s725_s24 = scalar_lea.vmem %s1804_s3, %s724_s22  ;;  %p859_p2 = scmp.lt.s32.totalorder (%p1574_p5), %s858_s14, 2 }
  0x7d   : > { %v828_v28 = vld [vmem:[%s725_s24] sm:$0x3] }
  0x7e   : > { %1114 = vmatmul.mubr.msk.bf16.vlgmr.msra.gmra.mrb[0].mxu0 %vm781_vm0, %v1327_v23  ;;  %v833_v30 = vrot.slane %v828_v28, %v832_v26  ;;  %v837_v32 = vrot.slane %v828_v28, %v836_v29 }
  0xf3   : > { %v749_v27 = vpop.permute.xlu0 %748 }
  0xf7   : > { %v754_v35 = vpop.permute.xlu0 %753 }
 0x151   : > { %v819_v31 = vpop.f32.mrb[0].mxu0 }
 0x152   : > { %v820_v33 = vadd.f32 %v819_v31, %v749_v27  ;;  %v821_v34 = vpop.f32.mrb[1].mxu0 }
 0x153   : > { %v822_v36 = vadd.f32 %v821_v34, %v749_v27  ;;  %v823_v37 = vpop.f32.mrb[2].mxu0  ;;  %855 = sbr.rel (!%p1574_p5) target bundleno = 375 (0x177), region = 106 }
 0x154   : > { %v840_v38 = vadd.f32 %v833_v30, %v820_v33  ;;  %v824_v39 = vadd.f32 %v823_v37, %v754_v35  ;;  %v825_v40 = vpop.f32.mrb[3].mxu0 }
 0x155   : > { %v841_v41 = vadd.f32 %v837_v32, %v822_v36  ;;  %v826_v42 = vadd.f32 %v825_v40, %v754_v35 }
 0x156   : > { %844 = vst [vmem:[%s700_s30] sm:$0xff] %v840_v38  ;;  %v842_v43 = vadd.f32 %v833_v30, %v824_v39 }
 0x157   : > { %845 = vst [vmem:[%s700_s30 + $0x8] sm:$0xff] %v841_v41  ;;  %v843_v44 = vadd.f32 %v837_v32, %v826_v42 }
 0x158   : > { %846 = vst [vmem:[%s700_s30 + $0x10] sm:$0xf] %v842_v43 }
 0x159   : > { %847 = vst [vmem:[%s700_s30 + $0x18] sm:$0xf] %v843_v44 }
 0x15a   : > { %s1830_s14 = smov (!%p859_p2, %s858_s14), 2 }
 0x15b   : > { %s1737_s29 = sshll.u32 %s1830_s14, 8 }
 0x15c   : > { %s863_s10 = ssub.s32 512, %s1737_s29 }
 0x15d   : > { %864 = vsyncadd %s1729_s1, %s863_s10  ;;  %p1118_p3 = scmp.ne.s32.totalorder %s1737_s29, 0  ;;  %s1130_s25 = sshll.u32 %s1462_s18, 8 }
 0x15e   : > { %s1746_s8 = scalar_lea.hbm %s1805_s4, %s1130_s25  ;;  %s1120_s11 = sshll.u32 %s1830_s14, 3 }
 0x15f   : > { %s872_s5 = sshll.u32 %s700_s30, 4  ;;  %s1507_s7 = smov [#allocation3]   ;;  %s1749_s5 = int_to_ptr.vmem [resolvable:$true] %s872_s5 }
 0x160   : > { %s1328_s6 = scalar_lea.vmem %s1749_s5, %s1737_s29  ;;  %s1332_s21 = sshll.u32 %s1507_s7, 4  ;;  %s1333_s21 = int_to_ptr.vmem [resolvable:$false] %s1332_s21 }
 0x161   : > { %p1329_p5 = scmp.ne.s32.totalorder %s1749_s5, %s1328_s6  ;;  %s1334_s18 = scalar_lea.vmem %s1333_s21, 1024 }
 0x162   : > { %p1335_p7 = scmp.lt.s32.totalorder %s1749_s5, %s1333_s21  ;;  %p1336_p8 = scmp.lt.s32.totalorder %s1334_s18, %s1328_s6 }
 0x163   : > { %p1330_p4 = pnand %p1329_p5, %p1118_p3 }
 0x164   : > { %p1337_p11 = por %p1336_p8, %p1335_p7 }
 0x165   : > { %p1331_p6 = pneg %p1330_p4 }
 0x167   : > { %p1338_p12 = pnand %p1337_p11, %p1331_p6 }
 0x169   : > { %1341 = shalt.err (!%p1338_p12)
}
 0x16a   : > { %s1342_s22 = scalar_lea.hbm %s1746_s8, %s1737_s29  ;;  %s1346_s24 = scalar_lea.hbm %s1805_s4, 768 }
 0x16b   : > { %p1343_p13 = scmp.ne.s32.totalorder %s1746_s8, %s1342_s22  ;;  %p1347_p2 = scmp.lt.u32.totalorder %s1746_s8, %s1805_s4 }
 0x16c   : > { %p1348_p5 = scmp.lt.u32.totalorder %s1346_s24, %s1342_s22  ;;  %p1350_p6 = scmp.lt.u32.totalorder %s1342_s22, %s1746_s8 }
 0x16d   : > { %p1344_p0 = pnand %p1343_p13, %p1118_p3 }
 0x16e   : > { %p1349_p4 = por %p1348_p5, %p1347_p2 }
 0x16f   : > { %p1345_p1 = pneg %p1344_p0 }
 0x170   : > { %p1351_p7 = por %p1350_p6, %p1349_p4 }
 0x172   : > { %p1352_p8 = pnand %p1351_p7, %p1345_p1 }
 0x174   : > { %1355 = shalt.err (!%p1352_p8)
}
 0x175   : > { %s1508_s25 = smov 256   ;;  %s1509_s12 = smov 384  }
 0x176   : > { %878 = dma.vmem_to_hbm [thread:$0]  (%p1118_p3), %s1749_s5, %s1737_s29, %s1746_s8, %s1729_s1, %s1508_s25, %s1509_s12, %s1120_s11  }
 0x177 PF: > { %s887_s13 = sand.u32 1, %s1450_s15   ;;  %p1135_p11 = pnand %p1077_p10, %p1585_p9 }
 0x178   : > { %s888_s6 = scalar_lea.sflag [#allocation4], %s887_s13 }
 0x179   : > { %1445 = dma.done.wait (!%p1135_p11), %s888_s6, 512  }
 0x17a   : > { %1447 = vsyncadd (!%p1135_p11), %s888_s6, 4294966784  ;;  %s17_s20 = sadd.s32 1, %s1470_s20   ;;  %s1816_s15 = smov %s1454_s16 }
 0x17b   : > { %p14_p12 = scmp.ge.s32.totalorder %s17_s20, 4   ;;  %s1817_s16 = smov %s1458_s17 }
 0x17c   : > { %s1818_s17 = smov %s1583_s27  ;;  %s1819_s18 = smov %s1466_s19 }
 0x17d   : > { %s1820_s19 = smov %s1822_s23  ;;  %16 = sbr.rel (!%p14_p12) target bundleno = 6 (0x6), region = 213 }
 0x184   :  { %893 = vsyncpa [#allocation4], 1 }
 0x185   :  { %895 = vsyncpa [#allocation4 + $0x1], 1 }

</bundles_post_ra>
